<compile_context>
chip_gen: v7x
topology: tpu7x:2x2x1
jax: 0.10.0
libtpu: 0.0.40
codegen_flags: <defaults>
</compile_context>

<pallas_src>
import functools

import jax
import jax.numpy as jnp
from jax import lax
from jax.experimental import pallas as pl
from jax.experimental.pallas import tpu as pltpu


# ----------------------------------------------------------------------------
# Wrapper-side (one-time, XLA) parameter preparation.
# ----------------------------------------------------------------------------
def _banded_conv_weights(w_hwio, W):
    """(3, 3, Cin, Cout) HWIO weights -> (3, W*Cin, W*Cout) banded matrices.

    B[ky, xin*Cin + ci, xout*Cout + co] = w[ky, xin - xout + 1, ci, co]
    when |xin - xout| <= 1, else 0.  Out-of-range taps multiply zero-padded
    inputs, so truncating them keeps "same" (padding=1) semantics exactly.
    """
    KH, KW, CI, CO = w_hwio.shape
    xs = jnp.arange(W)
    ks = jnp.arange(KW)
    # sel[kx, xin, xout] = 1 iff xin == xout + kx - 1   (padding = 1)
    sel = (xs[None, :, None] == xs[None, None, :] + ks[:, None, None] - 1)
    sel = sel.astype(w_hwio.dtype)
    B = jnp.einsum("kux,ykio->yuixo", sel, w_hwio)       # (KH, W, CI, W, CO)
    return B.reshape(KH, W * CI, W * CO)


def _pool_selectors(W, Cout):
    """0/1 matrices selecting even / odd x-columns from the lane-flattened
    (x*Cout + c) layout; shape (2, W*Cout, (W//2)*Cout)."""
    Wh = W // 2
    lin = jnp.arange(W * Cout)
    lout = jnp.arange(Wh * Cout)
    xi, ci = lin[:, None] // Cout, lin[:, None] % Cout
    xo, co = lout[None, :] // Cout, lout[None, :] % Cout
    s_even = ((xi == 2 * xo) & (ci == co)).astype(jnp.float32)
    s_odd = ((xi == 2 * xo + 1) & (ci == co)).astype(jnp.float32)
    return jnp.stack([s_even, s_odd], axis=0)


# ----------------------------------------------------------------------------
# Fused kernel: one batch element per grid step.
#   x_ref   : (1, H, W*Cin)        row-flattened NHWC input
#   w1_ref  : (3, W*Cin,  W*Cout)  banded conv1 weights (one per ky)
#   b1_ref  : (1, W*Cout)          conv1 bias tiled over x
#   w2_ref  : (3, W*Cout, W*Cout)  banded conv2 weights
#   b2_ref  : (1, W*Cout)          conv2 bias tiled over x
#   sel_ref : (2, W*Cout, Wh*Cout) pool selection matrices
#   feat_ref: (1, H,  W*Cout)      relu(conv2(relu(conv1(x))))
#   pool_ref: (1, Hh, Wh*Cout)     2x2/2 max pool of feat
#   xp1/xp2 : VMEM scratch with one zero row of padding above/below.
# ----------------------------------------------------------------------------
def _encoder_block_kernel(x_ref, w1_ref, b1_ref, w2_ref, b2_ref, sel_ref,
                          feat_ref, pool_ref, xp1_ref, xp2_ref,
                          *, H, W, Cin, Cout):
    Hh = H // 2

    # ---- conv1 + ReLU (zero padding lives in VMEM scratch) ------------------
    xp1_ref[...] = jnp.zeros_like(xp1_ref)
    xp1_ref[pl.ds(1, H), :] = x_ref[0]                     # interior rows

    acc = jnp.zeros((H, W * Cout), jnp.float32)
    for ky in range(3):                                    # 3 fat MXU pushes
        acc = acc + jnp.dot(xp1_ref[pl.ds(ky, H), :], w1_ref[ky],
                            preferred_element_type=jnp.float32)
    h1 = jnp.maximum(acc + b1_ref[...], 0.0)               # (H, W*Cout) lane-dense

    # ---- conv2 + ReLU (intermediate never leaves VMEM) ----------------------
    xp2_ref[...] = jnp.zeros_like(xp2_ref)
    xp2_ref[pl.ds(1, H), :] = h1

    acc = jnp.zeros((H, W * Cout), jnp.float32)
    for ky in range(3):
        acc = acc + jnp.dot(xp2_ref[pl.ds(ky, H), :], w2_ref[ky],
                            preferred_element_type=jnp.float32)
    h2 = jnp.maximum(acc + b2_ref[...], 0.0)               # (H, W*Cout)

    feat_ref[...] = h2[None]                               # lane-dense store

    # ---- 2x2 max pool, stride 2 ---------------------------------------------
    hr = h2.reshape(Hh, 2, W * Cout)
    a = jnp.maximum(hr[:, 0, :], hr[:, 1, :])              # max over H pairs
    # W-pair max + lane compaction via exact 0/1 selection matmuls (MXU).
    p = jnp.maximum(
        jnp.dot(a, sel_ref[0], preferred_element_type=jnp.float32),
        jnp.dot(a, sel_ref[1], preferred_element_type=jnp.float32))
    pool_ref[...] = p[None]


# ----------------------------------------------------------------------------
# EncoderBlock forward (matches the PyTorch module): returns (x, x_pooled) NCHW.
# ----------------------------------------------------------------------------
def encoder_block(x_nchw, w1_oihw, b1, w2_oihw, b2):
    N, Cin, H, W = x_nchw.shape
    Cout = w1_oihw.shape[0]
    Hh, Wh = H // 2, W // 2

    # One-time layout / weight prep (plain XLA glue).
    x = jnp.transpose(x_nchw, (0, 2, 3, 1)).reshape(N, H, W * Cin)
    x = x.astype(jnp.float32)
    w1 = jnp.transpose(w1_oihw, (2, 3, 1, 0)).astype(jnp.float32)   # HWIO
    w2 = jnp.transpose(w2_oihw, (2, 3, 1, 0)).astype(jnp.float32)
    B1 = _banded_conv_weights(w1, W)                     # (3, W*Cin,  W*Cout)
    B2 = _banded_conv_weights(w2, W)                     # (3, W*Cout, W*Cout)
    b1r = jnp.tile(b1.astype(jnp.float32), W).reshape(1, W * Cout)
    b2r = jnp.tile(b2.astype(jnp.float32), W).reshape(1, W * Cout)
    sel = _pool_selectors(W, Cout)                       # (2, W*Cout, Wh*Cout)

    kernel = functools.partial(_encoder_block_kernel, H=H, W=W, Cin=Cin, Cout=Cout)
    feat_flat, pool_flat = pl.pallas_call(
        kernel,
        out_shape=(jax.ShapeDtypeStruct((N, H, W * Cout), jnp.float32),
                   jax.ShapeDtypeStruct((N, Hh, Wh * Cout), jnp.float32)),
        grid=(N,),
        in_specs=[
            pl.BlockSpec((1, H, W * Cin), lambda n: (n, 0, 0)),
            pl.BlockSpec((3, W * Cin, W * Cout), lambda n: (0, 0, 0)),
            pl.BlockSpec((1, W * Cout), lambda n: (0, 0)),
            pl.BlockSpec((3, W * Cout, W * Cout), lambda n: (0, 0, 0)),
            pl.BlockSpec((1, W * Cout), lambda n: (0, 0)),
            pl.BlockSpec((2, W * Cout, Wh * Cout), lambda n: (0, 0, 0)),
        ],
        out_specs=(
            pl.BlockSpec((1, H, W * Cout), lambda n: (n, 0, 0)),
            pl.BlockSpec((1, Hh, Wh * Cout), lambda n: (n, 0, 0)),
        ),
        scratch_shapes=[
            pltpu.VMEM((H + 2, W * Cin), jnp.float32),    # padded input rows
            pltpu.VMEM((H + 2, W * Cout), jnp.float32),   # padded hidden rows
        ],
        compiler_params=pltpu.CompilerParams(dimension_semantics=("parallel",)),
    )(x, B1, b1r, B2, b2r, sel)

    feat = jnp.transpose(feat_flat.reshape(N, H, W, Cout), (0, 3, 1, 2))
    pooled = jnp.transpose(pool_flat.reshape(N, Hh, Wh, Cout), (0, 3, 1, 2))
    return feat, pooled


# Pure-JAX reference (NCHW) for correctness checking.
def encoder_block_ref(x, w1, b1, w2, b2):
    dn = ("NCHW", "OIHW", "NCHW")
    h = lax.conv_general_dilated(x, w1, (1, 1), "SAME", dimension_numbers=dn)
    h = jax.nn.relu(h + b1[None, :, None, None])
    h = lax.conv_general_dilated(h, w2, (1, 1), "SAME", dimension_numbers=dn)
    h = jax.nn.relu(h + b2[None, :, None, None])
    p = lax.reduce_window(h, -jnp.inf, lax.max,
                          (1, 1, 2, 2), (1, 1, 2, 2), "VALID")
    return h, p


if __name__ == "__main__":
    N, Cin, Cout, H, W = 2, 4, 8, 16, 16

    key = jax.random.PRNGKey(0)
    k0, k1, k2, k3, k4 = jax.random.split(key, 5)
    x = jax.random.normal(k0, (N, Cin, H, W), jnp.float32)
    # Deterministic synthetic parameters (shapes per nn.Conv2d: OIHW / (O,))
    w1 = jax.random.normal(k1, (Cout, Cin, 3, 3), jnp.float32) * 0.2
    b1 = jax.random.normal(k2, (Cout,), jnp.float32) * 0.1
    w2 = jax.random.normal(k3, (Cout, Cout, 3, 3), jnp.float32) * 0.2
    b2 = jax.random.normal(k4, (Cout,), jnp.float32) * 0.1

    feat, pooled = encoder_block(x, w1, b1, w2, b2)
    jax.block_until_ready((feat, pooled))

    ref_feat, ref_pooled = encoder_block_ref(x, w1, b1, w2, b2)
    assert feat.shape == (N, Cout, H, W)
    assert pooled.shape == (N, Cout, H // 2, W // 2)
    assert jnp.allclose(feat, ref_feat, atol=1e-3, rtol=1e-3)
    assert jnp.allclose(pooled, ref_pooled, atol=1e-3, rtol=1e-3)

    print("KERNEL_OK")
</pallas_src>

<mosaic_0001>
module attributes {stable_mosaic.version = 11 : i64} {
  func.func @_encoder_block_kernel(%arg0: i32, %arg1: memref<1x16x64xf32, #tpu.memory_space<vmem>>, %arg2: memref<3x64x128xf32, #tpu.memory_space<vmem>>, %arg3: memref<1x128xf32, #tpu.memory_space<vmem>>, %arg4: memref<3x128x128xf32, #tpu.memory_space<vmem>>, %arg5: memref<1x128xf32, #tpu.memory_space<vmem>>, %arg6: memref<2x128x64xf32, #tpu.memory_space<vmem>>, %arg7: memref<1x16x128xf32, #tpu.memory_space<vmem>>, %arg8: memref<1x8x64xf32, #tpu.memory_space<vmem>>, %arg9: memref<18x64xf32, #tpu.memory_space<vmem>>, %arg10: memref<18x128xf32, #tpu.memory_space<vmem>>) attributes {dimension_semantics = [#tpu.dimension_semantics<parallel>], iteration_bounds = array<i64: 2>, scalar_prefetch = 0 : i64, scratch_operands = 2 : i64, tpu.core_type = #tpu.core_type<tc>, window_params = [{transform_indices = @transform_0, window_bounds = array<i64: 1, 16, 64>}, {pipeline_mode = #tpu.pipeline_mode<synchronous>, transform_indices = @transform_1, window_bounds = array<i64: 3, 64, 128>}, {pipeline_mode = #tpu.pipeline_mode<synchronous>, transform_indices = @transform_2, window_bounds = array<i64: 1, 128>}, {pipeline_mode = #tpu.pipeline_mode<synchronous>, transform_indices = @transform_3, window_bounds = array<i64: 3, 128, 128>}, {pipeline_mode = #tpu.pipeline_mode<synchronous>, transform_indices = @transform_4, window_bounds = array<i64: 1, 128>}, {pipeline_mode = #tpu.pipeline_mode<synchronous>, transform_indices = @transform_5, window_bounds = array<i64: 2, 128, 64>}, {transform_indices = @transform_6, window_bounds = array<i64: 1, 16, 128>}, {transform_indices = @transform_7, window_bounds = array<i64: 1, 8, 64>}]} {
    %cst = arith.constant 0.000000e+00 : f32
    %0 = vector.broadcast %cst : f32 to vector<18x64xf32>
    %c0 = arith.constant 0 : index
    %c0_0 = arith.constant 0 : index
    %1 = vector.load %arg9[%c0, %c0_0] : memref<18x64xf32, #tpu.memory_space<vmem>>, vector<18x64xf32>
    tpu.vector_store %arg9[%c0, %c0_0], %0 {strides = array<i32>} : memref<18x64xf32, #tpu.memory_space<vmem>>, vector<18x64xf32>,
    %c0_1 = arith.constant 0 : index
    %c0_2 = arith.constant 0 : index
    %c0_3 = arith.constant 0 : index
    %2 = vector.load %arg1[%c0_1, %c0_2, %c0_3] : memref<1x16x64xf32, #tpu.memory_space<vmem>>, vector<1x16x64xf32>
    %3 = vector.shape_cast %2 : vector<1x16x64xf32> to vector<16x64xf32>
    %c1 = arith.constant 1 : index
    %c0_4 = arith.constant 0 : index
    %4 = vector.load %arg9[%c1, %c0_4] : memref<18x64xf32, #tpu.memory_space<vmem>>, vector<16x64xf32>
    tpu.vector_store %arg9[%c1, %c0_4], %3 {strides = array<i32>} : memref<18x64xf32, #tpu.memory_space<vmem>>, vector<16x64xf32>,
    %cst_5 = arith.constant 0.000000e+00 : f32
    %5 = vector.broadcast %cst_5 : f32 to vector<16x128xf32>
    %c0_6 = arith.constant 0 : index
    %c0_7 = arith.constant 0 : index
    %6 = vector.load %arg9[%c0_6, %c0_7] : memref<18x64xf32, #tpu.memory_space<vmem>>, vector<16x64xf32>
    %c0_8 = arith.constant 0 : index
    %c0_9 = arith.constant 0 : index
    %c0_10 = arith.constant 0 : index
    %7 = vector.load %arg2[%c0_8, %c0_9, %c0_10] : memref<3x64x128xf32, #tpu.memory_space<vmem>>, vector<1x64x128xf32>
    %8 = vector.shape_cast %7 : vector<1x64x128xf32> to vector<64x128xf32>
    %cst_11 = arith.constant dense<0.000000e+00> : vector<16x128xf32>
    %9 = tpu.matmul %6, %8, %cst_11 {dimension_numbers = #tpu.dot_dimension_numbers<[1], [0], [0], [1], [0, 0, 1, 1], [], []>} : vector<16x64xf32>, vector<64x128xf32>, vector<16x128xf32> -> vector<16x128xf32>
    %10 = arith.addf %5, %9 : vector<16x128xf32>
    %c1_12 = arith.constant 1 : index
    %c0_13 = arith.constant 0 : index
    %11 = vector.load %arg9[%c1_12, %c0_13] : memref<18x64xf32, #tpu.memory_space<vmem>>, vector<16x64xf32>
    %c1_14 = arith.constant 1 : index
    %c0_15 = arith.constant 0 : index
    %c0_16 = arith.constant 0 : index
    %12 = vector.load %arg2[%c1_14, %c0_15, %c0_16] : memref<3x64x128xf32, #tpu.memory_space<vmem>>, vector<1x64x128xf32>
    %13 = vector.shape_cast %12 : vector<1x64x128xf32> to vector<64x128xf32>
    %cst_17 = arith.constant dense<0.000000e+00> : vector<16x128xf32>
    %14 = tpu.matmul %11, %13, %cst_17 {dimension_numbers = #tpu.dot_dimension_numbers<[1], [0], [0], [1], [0, 0, 1, 1], [], []>} : vector<16x64xf32>, vector<64x128xf32>, vector<16x128xf32> -> vector<16x128xf32>
    %15 = arith.addf %10, %14 : vector<16x128xf32>
    %c2 = arith.constant 2 : index
    %c0_18 = arith.constant 0 : index
    %16 = vector.load %arg9[%c2, %c0_18] : memref<18x64xf32, #tpu.memory_space<vmem>>, vector<16x64xf32>
    %c2_19 = arith.constant 2 : index
    %c0_20 = arith.constant 0 : index
    %c0_21 = arith.constant 0 : index
    %17 = vector.load %arg2[%c2_19, %c0_20, %c0_21] : memref<3x64x128xf32, #tpu.memory_space<vmem>>, vector<1x64x128xf32>
    %18 = vector.shape_cast %17 : vector<1x64x128xf32> to vector<64x128xf32>
    %cst_22 = arith.constant dense<0.000000e+00> : vector<16x128xf32>
    %19 = tpu.matmul %16, %18, %cst_22 {dimension_numbers = #tpu.dot_dimension_numbers<[1], [0], [0], [1], [0, 0, 1, 1], [], []>} : vector<16x64xf32>, vector<64x128xf32>, vector<16x128xf32> -> vector<16x128xf32>
    %20 = arith.addf %15, %19 : vector<16x128xf32>
    %c0_23 = arith.constant 0 : index
    %c0_24 = arith.constant 0 : index
    %21 = vector.load %arg3[%c0_23, %c0_24] : memref<1x128xf32, #tpu.memory_space<vmem>>, vector<1x128xf32>
    %22 = vector.broadcast %21 : vector<1x128xf32> to vector<16x128xf32>
    %23 = arith.addf %20, %22 : vector<16x128xf32>
    %cst_25 = arith.constant 0.000000e+00 : f32
    %24 = vector.broadcast %cst_25 : f32 to vector<16x128xf32>
    %25 = arith.maximumf %23, %24 : vector<16x128xf32>
    %cst_26 = arith.constant 0.000000e+00 : f32
    %26 = vector.broadcast %cst_26 : f32 to vector<18x128xf32>
    %c0_27 = arith.constant 0 : index
    %c0_28 = arith.constant 0 : index
    %27 = vector.load %arg10[%c0_27, %c0_28] : memref<18x128xf32, #tpu.memory_space<vmem>>, vector<18x128xf32>
    tpu.vector_store %arg10[%c0_27, %c0_28], %26 {strides = array<i32>} : memref<18x128xf32, #tpu.memory_space<vmem>>, vector<18x128xf32>,
    %c1_29 = arith.constant 1 : index
    %c0_30 = arith.constant 0 : index
    %28 = vector.load %arg10[%c1_29, %c0_30] : memref<18x128xf32, #tpu.memory_space<vmem>>, vector<16x128xf32>
    tpu.vector_store %arg10[%c1_29, %c0_30], %25 {strides = array<i32>} : memref<18x128xf32, #tpu.memory_space<vmem>>, vector<16x128xf32>,
    %cst_31 = arith.constant 0.000000e+00 : f32
    %29 = vector.broadcast %cst_31 : f32 to vector<16x128xf32>
    %c0_32 = arith.constant 0 : index
    %c0_33 = arith.constant 0 : index
    %30 = vector.load %arg10[%c0_32, %c0_33] : memref<18x128xf32, #tpu.memory_space<vmem>>, vector<16x128xf32>
    %c0_34 = arith.constant 0 : index
    %c0_35 = arith.constant 0 : index
    %c0_36 = arith.constant 0 : index
    %31 = vector.load %arg4[%c0_34, %c0_35, %c0_36] : memref<3x128x128xf32, #tpu.memory_space<vmem>>, vector<1x128x128xf32>
    %32 = vector.shape_cast %31 : vector<1x128x128xf32> to vector<128x128xf32>
    %cst_37 = arith.constant dense<0.000000e+00> : vector<16x128xf32>
    %33 = tpu.matmul %30, %32, %cst_37 {dimension_numbers = #tpu.dot_dimension_numbers<[1], [0], [0], [1], [0, 0, 1, 1], [], []>} : vector<16x128xf32>, vector<128x128xf32>, vector<16x128xf32> -> vector<16x128xf32>
    %34 = arith.addf %29, %33 : vector<16x128xf32>
    %c1_38 = arith.constant 1 : index
    %c0_39 = arith.constant 0 : index
    %35 = vector.load %arg10[%c1_38, %c0_39] : memref<18x128xf32, #tpu.memory_space<vmem>>, vector<16x128xf32>
    %c1_40 = arith.constant 1 : index
    %c0_41 = arith.constant 0 : index
    %c0_42 = arith.constant 0 : index
    %36 = vector.load %arg4[%c1_40, %c0_41, %c0_42] : memref<3x128x128xf32, #tpu.memory_space<vmem>>, vector<1x128x128xf32>
    %37 = vector.shape_cast %36 : vector<1x128x128xf32> to vector<128x128xf32>
    %cst_43 = arith.constant dense<0.000000e+00> : vector<16x128xf32>
    %38 = tpu.matmul %35, %37, %cst_43 {dimension_numbers = #tpu.dot_dimension_numbers<[1], [0], [0], [1], [0, 0, 1, 1], [], []>} : vector<16x128xf32>, vector<128x128xf32>, vector<16x128xf32> -> vector<16x128xf32>
    %39 = arith.addf %34, %38 : vector<16x128xf32>
    %c2_44 = arith.constant 2 : index
    %c0_45 = arith.constant 0 : index
    %40 = vector.load %arg10[%c2_44, %c0_45] : memref<18x128xf32, #tpu.memory_space<vmem>>, vector<16x128xf32>
    %c2_46 = arith.constant 2 : index
    %c0_47 = arith.constant 0 : index
    %c0_48 = arith.constant 0 : index
    %41 = vector.load %arg4[%c2_46, %c0_47, %c0_48] : memref<3x128x128xf32, #tpu.memory_space<vmem>>, vector<1x128x128xf32>
    %42 = vector.shape_cast %41 : vector<1x128x128xf32> to vector<128x128xf32>
    %cst_49 = arith.constant dense<0.000000e+00> : vector<16x128xf32>
    %43 = tpu.matmul %40, %42, %cst_49 {dimension_numbers = #tpu.dot_dimension_numbers<[1], [0], [0], [1], [0, 0, 1, 1], [], []>} : vector<16x128xf32>, vector<128x128xf32>, vector<16x128xf32> -> vector<16x128xf32>
    %44 = arith.addf %39, %43 : vector<16x128xf32>
    %c0_50 = arith.constant 0 : index
    %c0_51 = arith.constant 0 : index
    %45 = vector.load %arg5[%c0_50, %c0_51] : memref<1x128xf32, #tpu.memory_space<vmem>>, vector<1x128xf32>
    %46 = vector.broadcast %45 : vector<1x128xf32> to vector<16x128xf32>
    %47 = arith.addf %44, %46 : vector<16x128xf32>
    %cst_52 = arith.constant 0.000000e+00 : f32
    %48 = vector.broadcast %cst_52 : f32 to vector<16x128xf32>
    %49 = arith.maximumf %47, %48 : vector<16x128xf32>
    %50 = vector.shape_cast %49 : vector<16x128xf32> to vector<1x16x128xf32>
    %c0_53 = arith.constant 0 : index
    %c0_54 = arith.constant 0 : index
    %c0_55 = arith.constant 0 : index
    %51 = vector.load %arg7[%c0_53, %c0_54, %c0_55] : memref<1x16x128xf32, #tpu.memory_space<vmem>>, vector<1x16x128xf32>
    tpu.vector_store %arg7[%c0_53, %c0_54, %c0_55], %50 {strides = array<i32>} : memref<1x16x128xf32, #tpu.memory_space<vmem>>, vector<1x16x128xf32>,
    %52 = vector.shape_cast %49 : vector<16x128xf32> to vector<8x2x128xf32>
    %53 = vector.extract_strided_slice %52 {offsets = [0, 0, 0], sizes = [8, 1, 128], strides = [1, 1, 1]} : vector<8x2x128xf32> to vector<8x1x128xf32>
    %54 = vector.shape_cast %53 : vector<8x1x128xf32> to vector<8x128xf32>
    %55 = vector.extract_strided_slice %52 {offsets = [0, 1, 0], sizes = [8, 1, 128], strides = [1, 1, 1]} : vector<8x2x128xf32> to vector<8x1x128xf32>
    %56 = vector.shape_cast %55 : vector<8x1x128xf32> to vector<8x128xf32>
    %57 = arith.maximumf %54, %56 : vector<8x128xf32>
    %c0_56 = arith.constant 0 : index
    %c0_57 = arith.constant 0 : index
    %c0_58 = arith.constant 0 : index
    %58 = vector.load %arg6[%c0_56, %c0_57, %c0_58] : memref<2x128x64xf32, #tpu.memory_space<vmem>>, vector<1x128x64xf32>
    %59 = vector.shape_cast %58 : vector<1x128x64xf32> to vector<128x64xf32>
    %cst_59 = arith.constant dense<0.000000e+00> : vector<8x64xf32>
    %60 = tpu.matmul %57, %59, %cst_59 {dimension_numbers = #tpu.dot_dimension_numbers<[1], [0], [0], [1], [0, 0, 1, 1], [], []>} : vector<8x128xf32>, vector<128x64xf32>, vector<8x64xf32> -> vector<8x64xf32>
    %c1_60 = arith.constant 1 : index
    %c0_61 = arith.constant 0 : index
    %c0_62 = arith.constant 0 : index
    %61 = vector.load %arg6[%c1_60, %c0_61, %c0_62] : memref<2x128x64xf32, #tpu.memory_space<vmem>>, vector<1x128x64xf32>
    %62 = vector.shape_cast %61 : vector<1x128x64xf32> to vector<128x64xf32>
    %cst_63 = arith.constant dense<0.000000e+00> : vector<8x64xf32>
    %63 = tpu.matmul %57, %62, %cst_63 {dimension_numbers = #tpu.dot_dimension_numbers<[1], [0], [0], [1], [0, 0, 1, 1], [], []>} : vector<8x128xf32>, vector<128x64xf32>, vector<8x64xf32> -> vector<8x64xf32>
    %64 = arith.maximumf %60, %63 : vector<8x64xf32>
    %65 = vector.shape_cast %64 : vector<8x64xf32> to vector<1x8x64xf32>
    %c0_64 = arith.constant 0 : index
    %c0_65 = arith.constant 0 : index
    %c0_66 = arith.constant 0 : index
    %66 = vector.load %arg8[%c0_64, %c0_65, %c0_66] : memref<1x8x64xf32, #tpu.memory_space<vmem>>, vector<1x8x64xf32>
    tpu.vector_store %arg8[%c0_64, %c0_65, %c0_66], %65 {strides = array<i32>} : memref<1x8x64xf32, #tpu.memory_space<vmem>>, vector<1x8x64xf32>,
    return
  }
  func.func @transform_0(%arg0: i32) -> (i32, i32, i32) {
    %c0_i32 = arith.constant 0 : i32
    %c0_i32_0 = arith.constant 0 : i32
    %c0_i32_1 = arith.constant 0 : i32
    return %arg0, %c0_i32, %c0_i32_0 : i32, i32, i32
  }
  func.func @transform_1(%arg0: i32) -> (i32, i32, i32) {
    %c0_i32 = arith.constant 0 : i32
    %c0_i32_0 = arith.constant 0 : i32
    %c0_i32_1 = arith.constant 0 : i32
    %c0_i32_2 = arith.constant 0 : i32
    return %c0_i32, %c0_i32_0, %c0_i32_1 : i32, i32, i32
  }
  func.func @transform_2(%arg0: i32) -> (i32, i32) {
    %c0_i32 = arith.constant 0 : i32
    %c0_i32_0 = arith.constant 0 : i32
    %c0_i32_1 = arith.constant 0 : i32
    return %c0_i32, %c0_i32_0 : i32, i32
  }
  func.func @transform_3(%arg0: i32) -> (i32, i32, i32) {
    %c0_i32 = arith.constant 0 : i32
    %c0_i32_0 = arith.constant 0 : i32
    %c0_i32_1 = arith.constant 0 : i32
    %c0_i32_2 = arith.constant 0 : i32
    return %c0_i32, %c0_i32_0, %c0_i32_1 : i32, i32, i32
  }
  func.func @transform_4(%arg0: i32) -> (i32, i32) {
    %c0_i32 = arith.constant 0 : i32
    %c0_i32_0 = arith.constant 0 : i32
    %c0_i32_1 = arith.constant 0 : i32
    return %c0_i32, %c0_i32_0 : i32, i32
  }
  func.func @transform_5(%arg0: i32) -> (i32, i32, i32) {
    %c0_i32 = arith.constant 0 : i32
    %c0_i32_0 = arith.constant 0 : i32
    %c0_i32_1 = arith.constant 0 : i32
    %c0_i32_2 = arith.constant 0 : i32
    return %c0_i32, %c0_i32_0, %c0_i32_1 : i32, i32, i32
  }
  func.func @transform_6(%arg0: i32) -> (i32, i32, i32) {
    %c0_i32 = arith.constant 0 : i32
    %c0_i32_0 = arith.constant 0 : i32
    %c0_i32_1 = arith.constant 0 : i32
    return %arg0, %c0_i32, %c0_i32_0 : i32, i32, i32
  }
  func.func @transform_7(%arg0: i32) -> (i32, i32, i32) {
    %c0_i32 = arith.constant 0 : i32
    %c0_i32_0 = arith.constant 0 : i32
    %c0_i32_1 = arith.constant 0 : i32
    return %arg0, %c0_i32, %c0_i32_0 : i32, i32, i32
  }
}

</mosaic_0001>

<bundles_post_ra>
// kernel: tpu_custom_call.1
= control target key start
LH: loop header
LB: loop body
LE: loop exit
PB: predicated region body
PF: predicated region fallthrough
CT: control target
= control target key end

     0   :  { %13 = vsyncpa [#allocation5], 0  ;;  %s2823_s0 = inlined_call_operand.hbm [shape: f32[2,16,64], index: 0, kind: input, shape index: {}]   ;;  %s2824_s1 = inlined_call_operand.hbm [shape: f32[3,64,128], index: 1, kind: input, shape index: {}]   ;;  %s2825_s2 = inlined_call_operand.vmem [shape: f32[1,128], index: 2, kind: input, shape index: {}]   ;;  %s2826_s3 = inlined_call_operand.vmem [shape: f32[3,128,128], index: 3, kind: input, shape index: {}]   ;;  %s2827_s4 = inlined_call_operand.vmem [shape: f32[1,128], index: 4, kind: input, shape index: {}]   ;;  %s2828_s5 = inlined_call_operand.vmem [shape: f32[2,128,64], index: 5, kind: input, shape index: {}]   ;;  %s2829_s6 = inlined_call_operand.hbm [shape: f32[2,16,128], index: 6, kind: output, shape index: {0}]   ;;  %s2830_s7 = inlined_call_operand.hbm [shape: f32[2,8,64], index: 7, kind: output, shape index: {1}]  }
   0x1   :  { %15 = vsyncpa [#allocation5 + $0x1], 0 }
   0x2   :  { %16 = vsyncpa [#allocation8], 0 }
   0x3   :  { %17 = vsyncpa [#allocation6], 0 }
   0x4   :  { %19 = vsyncpa [#allocation6 + $0x1], 0 }
   0x5   :  { %20 = vsyncpa [#allocation11], 0 }
   0x6   :  { %22 = vsyncpa [#allocation11 + $0x1], 0  ;;  %s2293_s24 = smov 0   ;;  %s2295_s25 = smov 0  }
   0x7   :  { %s2297_s26 = smov 0   ;;  %s2299_s27 = smov 0  }
   0x8 LB: > { %s2314_s28 = sadd.s32 4294967295, %s2239_s27   ;;  %s1374_s29 = sadd.s32 4294967294, %s2239_s27   ;;  %s2239_s27 = sphi %s2299_s27, %s2852_s27   ;;  %s2235_s26 = sphi %s2297_s26, %s2851_s26   ;;  %s2231_s25 = sphi %s2295_s25, %s2850_s25   ;;  %s2227_s24 = sphi %s2293_s24, %s2849_s24  }
   0x9   : > { %p48_p0 = scmp.ne.s32.totalorder %s2231_s25, %s2227_s24  ;;  %p2831_p1 = scmp.eq.s32.totalorder %s2314_s28, 0 }
   0xa   : > { %p183_p3 = scmp.eq.s32.totalorder %s1374_s29, 1  ;;  %p1375_p5 = scmp.ge.s32.totalorder %s2239_s27, 1 }
   0xb   : > { %p2323_p4 = por %p2831_p1, %p48_p0  ;;  %p216_p7 = scmp.lt.s32.totalorder %s2239_s27, 3 }
   0xc   : > { %p2328_p6 = por %p183_p3, %p48_p0  ;;  %s2241_s10 = smov [#allocation7]  }
   0xd   : > { %s2835_s30 = scalar_select %p2323_p4, 1, 0 }
   0xe   : > { %s2836_s8 = scalar_select %p2328_p6, 1, 0 }
   0xf   : > { %p2333_p8 = pnand %p1375_p5, %p216_p7  ;;  %s228_s11 = sshll.u32 %s2241_s10, 4  ;;  %s2337_s11 = int_to_ptr.vmem [resolvable:$true] %s228_s11 }
  0x10   : > { %s2349_s13 = sadd.s32 1, %s2239_s27   ;;  %s35_s14 = sadd.s32 1, %s2235_s26 }
  0x11   : > { %s2837_s9 = scalar_select %p2333_p8, 1, 0 }
  0x12   : > { %p2019_p9 = pneg %p2333_p8  ;;  %s32_s15 = ssub.s32 %s2239_s27, %s2349_s13 }
  0x13   : > { %s2079_s18 = scalar_lea.hbm %s2824_s1, 3072 }
  0x14   : > { %p2344_p11 = pnand %p2019_p9, %p2831_p1  ;;  %p2080_p12 = scmp.ne.s32.totalorder %s2824_s1, %s2079_s18 }
  0x15   : > { %p2086_p5 = scmp.lt.u32.totalorder %s2079_s18, %s2824_s1 }
  0x16   : > { %p2081_p13 = pneg %p2344_p11 }
  0x18   : > { %p2082_p0 = pnand %p2081_p13, %p2080_p12 }
  0x1a   : > { %p2083_p3 = pneg %p2082_p0 }
  0x1c   : > { %p2088_p7 = pnand %p2086_p5, %p2083_p3 }
  0x1e   : > { %2091 = shalt.err (!%p2088_p7)
}
  0x1f   : > { %s2092_s23 = scalar_lea.vmem %s2337_s11, 3072  ;;  %p2100_p2 = scmp.lt.s32.totalorder %s2337_s11, %s2337_s11 }
  0x20   : > { %p2093_p9 = scmp.ne.s32.totalorder %s2337_s11, %s2092_s23  ;;  %p2101_p6 = scmp.lt.s32.totalorder %s2092_s23, %s2092_s23 }
  0x22   : > { %p2095_p10 = pnand %p2093_p9, %p2081_p13  ;;  %p2102_p4 = por %p2101_p6, %p2100_p2 }
  0x24   : > { %p2096_p1 = pneg %p2095_p10 }
  0x26   : > { %p2103_p8 = pnand %p2102_p4, %p2096_p1 }
  0x28   : > { %2106 = shalt.err (!%p2103_p8)
}
  0x29   : > { %s2834_s29 = smov 128   ;;  %s2243_s10 = smov 8  }
  0x2a   : > { %2022 = dma.hbm_to_vmem [thread:$0]  (!%p2344_p11), %s2824_s1, 3072, %s2337_s11, [#allocation8], %s2834_s29, %s2834_s29, %s2243_s10  }
  0x2b   : > { %p33_p1 = scmp.eq.s32.totalorder %s32_s15, 0  ;;  %p42_p2 = scmp.ne.s32.totalorder %s2235_s26, %s2231_s25 }
  0x2c   : > { %p43_p4 = scmp.eq.s32.totalorder %s2239_s27, 0  ;;  %p2035_p6 = scmp.lt.s32.totalorder %s2239_s27, 2 }
  0x2d   : > { %s2383_s18 = scalar_select %p33_p1, %s2235_s26, %s35_s14  }
  0x2e   : > { %p44_p8 = por %p43_p4, %p42_p2  ;;  %p2839_p10 = scmp.eq.s32.totalorder %s2314_s28, 1 }
  0x2f   : > { %s254_s12 = sand.u32 1, %s2235_s26   ;;  %s1457_s20 = sshll.u32 %s2239_s27, 8 }
  0x30   : > { %p2387_p12 = por %p2839_p10, %p42_p2  ;;  %s1378_s21 = sshll.u32 %s254_s12, 4 }
  0x31   : > { %s2396_s16 = scalar_lea.hbm %s2823_s0, %s1457_s20  ;;  %s258_s11 = scalar_lea.vmem [#allocation4], %s1378_s21 }
  0x32   : > { %s265_s14 = sshll.u32 %s258_s11, 4  ;;  %p2398_p11 = pnand %p2035_p6, %p44_p8  ;;  %s2402_s14 = int_to_ptr.vmem [resolvable:$true] %s265_s14 }
  0x33   : > { %s2404_s17 = scalar_lea.sflag [#allocation5], %s254_s12  ;;  %s2107_s29 = scalar_lea.hbm %s2396_s16, 256 }
  0x34   : > { %p2108_p13 = scmp.ne.s32.totalorder %s2396_s16, %s2107_s29  ;;  %p2109_p0 = pneg %p2398_p11 }
  0x35   : > { %s2112_s22 = scalar_lea.hbm %s2823_s0, 512  ;;  %p2113_p7 = scmp.lt.u32.totalorder %s2396_s16, %s2823_s0 }
  0x36   : > { %p2110_p3 = pnand %p2109_p0, %p2108_p13  ;;  %p2114_p9 = scmp.lt.u32.totalorder %s2112_s22, %s2107_s29 }
  0x37   : > { %p2116_p2 = scmp.lt.u32.totalorder %s2107_s29, %s2396_s16 }
  0x38   : > { %p2111_p5 = pneg %p2110_p3  ;;  %p2115_p1 = por %p2114_p9, %p2113_p7 }
  0x3a   : > { %p2117_p4 = por %p2116_p2, %p2115_p1 }
  0x3c   : > { %p2118_p6 = pnand %p2117_p4, %p2111_p5 }
  0x3e   : > { %2121 = shalt.err (!%p2118_p6)
}
  0x3f   : > { %s2122_s12 = scalar_lea.vmem %s2402_s14, 256  ;;  %s2244_s20 = smov [#allocation4]  }
  0x40   : > { %p2123_p8 = scmp.ne.s32.totalorder %s2402_s14, %s2122_s12  ;;  %s2127_s21 = sshll.u32 %s2244_s20, 4  ;;  %s2128_s21 = int_to_ptr.vmem [resolvable:$false] %s2127_s21 }
  0x41   : > { %s2129_s23 = scalar_lea.vmem %s2128_s21, 512  ;;  %p2130_p3 = scmp.lt.s32.totalorder %s2402_s14, %s2128_s21 }
  0x42   : > { %p2125_p10 = pnand %p2123_p8, %p2109_p0  ;;  %p2131_p7 = scmp.lt.s32.totalorder %s2129_s23, %s2122_s12 }
  0x44   : > { %p2126_p13 = pneg %p2125_p10  ;;  %p2132_p9 = por %p2131_p7, %p2130_p3 }
  0x46   : > { %p2133_p1 = pnand %p2132_p9, %p2126_p13 }
  0x48   : > { %2136 = shalt.err (!%p2133_p1)
}
  0x49   : > { %s2842_s29 = smov 128   ;;  %p2843_p0 = scmp.ne.s32.totalorder %s2837_s9, 0 }
  0x4a   : > { %2026 = dma.hbm_to_vmem [thread:$0]  (!%p2398_p11), %s2396_s16, 256, %s2402_s14, %s2404_s17, %s2842_s29, %s2842_s29, %s2243_s10  }
  0x4b   : > { %277 = sbr.rel (%p2843_p0) target bundleno = 913 (0x391), region = 44  ;;  %s2438_s22 = sand.u32 (!%p2843_p0), 1, %s2231_s25  }
  0x4c   : > { %s1382_s11 = sshll.u32 (!%p2843_p0), %s2438_s22, 4  ;;  %s280_s12 = scalar_lea.sflag (!%p2843_p0), [#allocation5], %s2438_s22 }
  0x4d   : > { %s283_s15 = scalar_lea.vmem (!%p2843_p0), [#allocation4], %s1382_s11  ;;  %p2844_p5 = scmp.ne.s32.totalorder (!%p2843_p0), %s2835_s30, 0 }
  0x52   : > { %2210 = dma.done.wait (%p2844_p5), %s280_s12, 256  }
  0x53   : > { %2212 = vsyncadd (%p2844_p5), %s280_s12, 4294967040  ;;  %p2845_p11 = scmp.eq.s32.totalorder %s2314_s28, 0 }
  0x55   : > { %2214 = dma.done.wait (%p2845_p11), [#allocation8], 3072   ;;  %p2846_p2 = pmov %p2845_p11 }
  0x56   : > { %vm323_vm0 = vcmask 523264   ;;  %vm326_vm1 = vcmask 517120   ;;  %v2245_v0 = vmov 0.0   ;;  %v345_v1 = vld [vmem:[#allocation7 + $0x40] sm:$0xff]  ;;  %v346_v2 = vld [vmem:[#allocation7 + $0x48] sm:$0xff]  ;;  %v347_v3 = vld [vmem:[#allocation7 + $0x50] sm:$0xff] }
  0x57   : > { %2216 = vsyncadd (%p2846_p2), [#allocation8], 4294964224  ;;  %324 = vst.msk [vmem:[#allocation2] sm:$0xff] %vm323_vm0, %v2245_v0  ;;  %v1809_v4 = vpack.c.bf16 %v346_v2, %v345_v1  ;;  %v348_v5 = vld [vmem:[#allocation7 + $0x58] sm:$0xff]  ;;  %v349_v7 = vld [vmem:[#allocation7 + $0x60] sm:$0xff]  ;;  %vm2247_vm2 = vmmov 0  }
  0x58   : > { %325 = vst.msk [vmem:[#allocation2 + $0x8] sm:$0xff] %vm323_vm0, %v2245_v0  ;;  %620 = vst [vmem:[#allocation3] sm:$0xff] %v2245_v0  ;;  %v1813_v6 = vpack.c.bf16 %v348_v5, %v347_v3  ;;  %v350_v8 = vld [vmem:[#allocation7 + $0x68] sm:$0xff]  ;;  %v328_v9 = vld [vmem:[%s283_s15] sm:$0xff]  ;;  %s2679_s30 = scalar_lea.vmem [#allocation9], %s1382_s11  ;;  %vm1053_vm3 = vcmask 1041409  }
  0x59   : > { %621 = vst [vmem:[#allocation3 + $0x8] sm:$0xff] %v2245_v0  ;;  %622 = vst [vmem:[#allocation3 + $0x10] sm:$0x3] %v2245_v0  ;;  %1810 = vmatprep.subr.bf16.mxu0 %v1809_v4  ;;  %v329_v10 = vld [vmem:[%s283_s15 + $0x8] sm:$0xff]  ;;  %v1817_v11 = vpack.c.bf16 %v350_v8, %v349_v7  ;;  %v351_v12 = vld [vmem:[#allocation7 + $0x70] sm:$0xff]  ;;  %vm1055_vm4 = vcmask 1042434  }
  0x5a   : > { %327 = vst.msk [vmem:[#allocation2 + $0x10] sm:$0x3] %vm326_vm1, %v2245_v0  ;;  %1812 = vmatpush3.bf16.msra.mxu0 %v1809_v4  ;;  %v352_v13 = vld [vmem:[#allocation7 + $0x78] sm:$0xff]  ;;  %v1393_v14 = vld [vmem:[%s2826_s3 + $0x80] sm:$0xff]  ;;  %v1395_v17 = vld [vmem:[%s2826_s3 + $0x90] sm:$0xff]  ;;  %vm1057_vm5 = vcmask 1043459  }
  0x5b   : > { %330 = vst.msk [vmem:[#allocation2 + $0x1] sm:$0xff] %vm323_vm0, %v328_v9  ;;  %331 = vst.msk [vmem:[#allocation2 + $0x9] sm:$0xff] %vm323_vm0, %v329_v10  ;;  %1814 = vmatprep.subr.bf16.mxu0 %v1813_v6  ;;  %v1821_v15 = vpack.c.bf16 %v352_v13, %v351_v12  ;;  %v1394_v16 = vld [vmem:[%s2826_s3 + $0x88] sm:$0xff]  ;;  %v1396_v18 = vld [vmem:[%s2826_s3 + $0x98] sm:$0xff]  ;;  %v2246_v12 = vmov 0.0|0.0   ;;  %vm1059_vm6 = vcmask 1044484  }
  0x5c   : > { %v334_v20 = vld [vmem:[#allocation7] sm:$0xff]  ;;  %v335_v21 = vld [vmem:[#allocation7 + $0x8] sm:$0xff]  ;;  %v1857_v22 = vpack.c.bf16 %v1394_v16, %v1393_v14  ;;  %v1861_v23 = vpack.c.bf16 %v1396_v18, %v1395_v17  ;;  %v1397_v24 = vld [vmem:[%s2826_s3 + $0xa0] sm:$0xff]  ;;  %vm1061_vm7 = vcmask 1045509   ;;  %vm1063_vm8 = vcmask 1046534   ;;  %s1246_s23 = sshll.u32 %s2679_s30, 4  ;;  %s2741_s23 = int_to_ptr.vmem [resolvable:$true] %s1246_s23 }
  0x5d   : > { %v1398_v25 = vld [vmem:[%s2826_s3 + $0xa8] sm:$0xff]  ;;  %v1825_v26 = vpack.c.bf16 %v335_v21, %v334_v20  ;;  %v336_v27 = vld [vmem:[#allocation7 + $0x10] sm:$0xff]  ;;  %v1399_v30 = vld [vmem:[%s2826_s3 + $0xb0] sm:$0xff]  ;;  %vm1065_vm9 = vcmask 1047559   ;;  %s1458_s29 = sshll.u32 %s2314_s28, 8  ;;  %s1228_s9 = scalar_lea.sflag [#allocation6], %s2438_s22 }
  0x5e   : > { %1816 = vmatpush3.bf16.msra.mxu0 %v1813_v6  ;;  %1858 = vmatprep.subr.bf16.mxu1 %v1857_v22  ;;  %v337_v28 = vld [vmem:[#allocation7 + $0x18] sm:$0xff]  ;;  %v1865_v29 = vpack.c.bf16 %v1398_v25, %v1397_v24  ;;  %v1400_v31 = vld [vmem:[%s2826_s3 + $0xb8] sm:$0xff]  ;;  %v338_v35 = vld [vmem:[#allocation7 + $0x20] sm:$0xff]  ;;  %s2747_s11 = scalar_lea.hbm %s2829_s6, %s1458_s29  ;;  %s2137_s10 = scalar_lea.vmem %s2741_s23, 256 }
  0x5f   : > { %1818 = vmatprep.subr.bf16.mxu0 %v1817_v11  ;;  %1860 = vmatpush3.bf16.msra.mxu1 %v1857_v22  ;;  %v1829_v33 = vpack.c.bf16 %v337_v28, %v336_v27  ;;  %v339_v36 = vld [vmem:[#allocation7 + $0x28] sm:$0xff]  ;;  %v1869_v37 = vpack.c.bf16 %v1400_v31, %v1399_v30  ;;  %v1401_v38 = vld [vmem:[%s2826_s3 + $0xc0] sm:$0xff]  ;;  %v1402_v39 = vld [vmem:[%s2826_s3 + $0xc8] sm:$0xff]  ;;  %p2138_p4 = scmp.ne.s32.totalorder %s2741_s23, %s2137_s10  ;;  %s2249_s16 = smov [#allocation9]  }
  0x60   : > { %1862 = vmatprep.subr.bf16.mxu1 %v1861_v23  ;;  %v1833_v40 = vpack.c.bf16 %v339_v36, %v338_v35  ;;  %v340_v41 = vld [vmem:[#allocation7 + $0x30] sm:$0xff]  ;;  %v341_v42 = vld [vmem:[#allocation7 + $0x38] sm:$0xff]  ;;  %v1873_v43 = vpack.c.bf16 %v1402_v39, %v1401_v38  ;;  %v518_v45 = vld [vmem:[#allocation7 + $0x80] sm:$0xff]  ;;  %s2141_s14 = sshll.u32 %s2249_s16, 4  ;;  %s2142_s14 = int_to_ptr.vmem [resolvable:$false] %s2141_s14 }
  0x61   : > { %v1837_v44 = vpack.c.bf16 %v341_v42, %v340_v41  ;;  %v519_v46 = vld [vmem:[#allocation7 + $0x88] sm:$0xff]  ;;  %v520_v48 = vld [vmem:[#allocation7 + $0x90] sm:$0xff]  ;;  %v521_v49 = vld [vmem:[#allocation7 + $0x98] sm:$0xff]  ;;  %p2139_p6 = pnand %p2138_p4, %p2387_p12  ;;  %p2144_p10 = scmp.lt.s32.totalorder %s2741_s23, %s2142_s14 }
  0x62   : > { %v342_v19 = vld [vmem:[#allocation2 + $0x1] sm:$0xff]  ;;  %1820 = vmatpush3.bf16.msra.mxu0 %v1817_v11  ;;  %v343_v32 = vld [vmem:[#allocation2 + $0x9] sm:$0xff]  ;;  %v1841_v47 = vpack.c.bf16 %v519_v46, %v518_v45  ;;  %v1845_v51 = vpack.c.bf16 %v521_v49, %v520_v48  ;;  %v523_v54 = vld [vmem:[#allocation7 + $0xa8] sm:$0xff] }
  0x63   : > { %1593 = vmatprep.mubr.msk.f32.mxu0 %vm323_vm0, %v342_v19  ;;  %1822 = vmatprep.subr.bf16.mxu0 %v1821_v15  ;;  %v332_v34 = vld [vmem:[#allocation2] sm:$0xff]  ;;  %v333_v50 = vld [vmem:[#allocation2 + $0x8] sm:$0xff]  ;;  %v522_v53 = vld [vmem:[#allocation7 + $0xa0] sm:$0xff]  ;;  %p2140_p8 = pneg %p2139_p6 }
  0x64   : > { %1864 = vmatpush3.bf16.msra.mxu1 %v1861_v23  ;;  %v515_v52 = vld [vmem:[#allocation2 + $0x2] sm:$0xff]  ;;  %v1849_v55 = vpack.c.bf16 %v523_v54, %v522_v53  ;;  %v516_v59 = vld [vmem:[#allocation2 + $0xa] sm:$0xff]  ;;  %v1404_v61 = vld [vmem:[%s2826_s3 + $0xd8] sm:$0xff] }
  0x65   : > { %1866 = vmatprep.subr.bf16.mxu1 %v1865_v29  ;;  %v524_v56 = vld [vmem:[#allocation7 + $0xb0] sm:$0xff]  ;;  %v525_v57 = vld [vmem:[#allocation7 + $0xb8] sm:$0xff]  ;;  %v1403_v60 = vld [vmem:[%s2826_s3 + $0xd0] sm:$0xff] }
  0x66   : > { %1824 = vmatpush3.bf16.msra.mxu0 %v1821_v15  ;;  %v1853_v58 = vpack.c.bf16 %v525_v57, %v524_v56  ;;  %v1877_v62 = vpack.c.bf16 %v1404_v61, %v1403_v60  ;;  %v1405_v63 = vld [vmem:[%s2826_s3 + $0xe0] sm:$0xff]  ;;  %v1406_v1 = vld [vmem:[%s2826_s3 + $0xe8] sm:$0xff]  ;;  %v1407_v3 = vld [vmem:[%s2826_s3 + $0xf0] sm:$0xff] }
  0x67   : > { %1826 = vmatprep.subr.bf16.mxu0 %v1825_v26  ;;  %v1881_v2 = vpack.c.bf16 %v1406_v1, %v1405_v63  ;;  %v1408_v4 = vld [vmem:[%s2826_s3 + $0xf8] sm:$0xff]  ;;  %v627_v6 = vld [vmem:[%s2826_s3] sm:$0xff]  ;;  %v628_v7 = vld [vmem:[%s2826_s3 + $0x8] sm:$0xff] }
  0x68   : > { %1868 = vmatpush3.bf16.msra.mxu1 %v1865_v29  ;;  %v1885_v5 = vpack.c.bf16 %v1408_v4, %v1407_v3  ;;  %v1889_v8 = vpack.c.bf16 %v628_v7, %v627_v6  ;;  %v997_v9 = vld [vmem:[%s2828_s5] sm:$0xff]  ;;  %v998_v10 = vld [vmem:[%s2828_s5 + $0x8] sm:$0xff]  ;;  %v999_v11 = vld [vmem:[%s2828_s5 + $0x10] sm:$0xff] }
  0x69   : > { %1594 = vmatmul.mubr.msk.f32.vlgmr.msra.gmra.mrb[0].mxu0 %vm323_vm0, %v343_v32  ;;  %1870 = vmatprep.subr.bf16.mxu1 %v1869_v37  ;;  %v1954_v13 = vpack.c.bf16 %v998_v10, %v997_v9  ;;  %v1000_v14 = vld [vmem:[%s2828_s5 + $0x18] sm:$0xff]  ;;  %v1001_v16 = vld [vmem:[%s2828_s5 + $0x20] sm:$0xff]  ;;  %v1002_v17 = vld [vmem:[%s2828_s5 + $0x28] sm:$0xff] }
  0x6a   : > { %1828 = vmatpush3.bf16.msra.mxu0 %v1825_v26  ;;  %1612 = vmatprep.mubr.msk.f32.mxu0 %vm323_vm0, %v332_v34  ;;  %v1957_v15 = vpack.c.bf16 %v1000_v14, %v999_v11  ;;  %v1960_v18 = vpack.c.bf16 %v1002_v17, %v1001_v16  ;;  %v1392_v19 = vld [vmem:[%s2825_s2] ss:$0 sm:$0xff]  ;;  %v629_v24 = vld [vmem:[%s2826_s3 + $0x10] sm:$0xff]  ;;  %v630_v25 = vld [vmem:[%s2826_s3 + $0x18] sm:$0xff] }
  0x6b   : > { %1830 = vmatprep.subr.bf16.mxu0 %v1829_v33  ;;  %v1893_v28 = vpack.c.bf16 %v630_v25, %v629_v24  ;;  %v631_v29 = vld [vmem:[%s2826_s3 + $0x20] sm:$0xff]  ;;  %v632_v30 = vld [vmem:[%s2826_s3 + $0x28] sm:$0xff]  ;;  %v633_v32 = vld [vmem:[%s2826_s3 + $0x30] sm:$0xff] }
  0x6c   : > { %1872 = vmatpush3.bf16.msra.mxu1 %v1869_v37  ;;  %v1897_v31 = vpack.c.bf16 %v632_v30, %v631_v29  ;;  %v635_v36 = vld [vmem:[%s2826_s3 + $0x40] sm:$0xff]  ;;  %v636_v37 = vld [vmem:[%s2826_s3 + $0x48] sm:$0xff]  ;;  %v637_v39 = vld [vmem:[%s2826_s3 + $0x50] sm:$0xff]  ;;  %v927_v30 = vlaneseq }
  0x6d   : > { %1874 = vmatprep.subr.bf16.mxu1 %v1873_v43  ;;  %v1905_v38 = vpack.c.bf16 %v636_v37, %v635_v36  ;;  %v639_v42 = vld [vmem:[%s2826_s3 + $0x60] sm:$0xff]  ;;  %v641_v45 = vld [vmem:[%s2826_s3 + $0x70] sm:$0xff]  ;;  %v642_v46 = vld [vmem:[%s2826_s3 + $0x78] sm:$0xff] }
  0x6e   : > { %1832 = vmatpush3.bf16.msra.mxu0 %v1829_v33  ;;  %v634_v33 = vld [vmem:[%s2826_s3 + $0x38] sm:$0xff]  ;;  %v1409_v48 = vld [vmem:[%s2826_s3 + $0x100] sm:$0xff]  ;;  %v1410_v49 = vld [vmem:[%s2826_s3 + $0x108] sm:$0xff] }
  0x6f   : > { %1834 = vmatprep.subr.bf16.mxu0 %v1833_v40  ;;  %v1901_v35 = vpack.c.bf16 %v634_v33, %v633_v32  ;;  %v1414_v56 = vld [vmem:[%s2826_s3 + $0x128] sm:$0xff]  ;;  %v1416_v60 = vld [vmem:[%s2826_s3 + $0x138] sm:$0xff]  ;;  %v1005_v16 = vld [vmem:[%s2828_s5 + $0x40] sm:$0xff]  ;;  %v928_v32 = vshrl.u32 %v927_v30, 7 }
  0x70   : > { %1876 = vmatpush3.bf16.msra.mxu1 %v1873_v43  ;;  %v640_v43 = vld [vmem:[%s2826_s3 + $0x68] sm:$0xff]  ;;  %v1420_v3 = vld [vmem:[%s2826_s3 + $0x158] sm:$0xff]  ;;  %v1011_v25 = vld [vmem:[%s2828_s5 + $0x70] sm:$0xff] }
  0x71   : > { %1878 = vmatprep.subr.bf16.mxu1 %v1877_v62  ;;  %v1418_v63 = vld [vmem:[%s2826_s3 + $0x148] sm:$0xff]  ;;  %v1424_v9 = vld [vmem:[%s2826_s3 + $0x178] sm:$0xff]  ;;  %v1425_v33 = vld [vmem:[%s2827_s4] ss:$0 sm:$0xff] }
  0x72   : > { %1836 = vmatpush3.bf16.msra.mxu0 %v1833_v40  ;;  %v638_v40 = vld [vmem:[%s2826_s3 + $0x58] sm:$0xff]  ;;  %v1422_v6 = vld [vmem:[%s2826_s3 + $0x168] sm:$0xff]  ;;  %v1440_v30 = vld [vmem:[%s2828_s5 + $0xb0] sm:$0xff] }
  0x73   : > { %1838 = vmatprep.subr.bf16.mxu0 %v1837_v44  ;;  %v1909_v41 = vpack.c.bf16 %v638_v40, %v637_v39  ;;  %v1004_v14 = vld [vmem:[%s2828_s5 + $0x38] sm:$0xff]  ;;  %v1006_v17 = vld [vmem:[%s2828_s5 + $0x48] sm:$0xff] }
  0x74   : > { %1880 = vmatpush3.bf16.msra.mxu1 %v1877_v62  ;;  %v1417_v62 = vld [vmem:[%s2826_s3 + $0x140] sm:$0xff] }
  0x75   : > { %1882 = vmatprep.subr.bf16.mxu1 %v1881_v2  ;;  %v1937_v1 = vpack.c.bf16 %v1418_v63, %v1417_v62 }
  0x76   : > { %1840 = vmatpush3.bf16.msra.mxu0 %v1837_v44  ;;  %v1913_v44 = vpack.c.bf16 %v640_v43, %v639_v42 }
  0x77   : > { %1842 = vmatprep.subr.bf16.mxu0 %v1841_v47 }
  0x78   : > { %1884 = vmatpush3.bf16.msra.mxu1 %v1881_v2  ;;  %v1419_v2 = vld [vmem:[%s2826_s3 + $0x150] sm:$0xff] }
  0x79   : > { %1613 = vmatmul.mubr.msk.f32.vlgmr.msra.gmra.mrb[0].mxu0 %vm323_vm0, %v333_v50  ;;  %1886 = vmatprep.subr.bf16.mxu1 %v1885_v5  ;;  %v1921_v50 = vpack.c.bf16 %v1410_v49, %v1409_v48  ;;  %v1941_v4 = vpack.c.bf16 %v1420_v3, %v1419_v2 }
  0x7a   : > { %1844 = vmatpush3.bf16.msra.mxu0 %v1841_v47  ;;  %1631 = vmatprep.mubr.msk.f32.mxu0 %vm323_vm0, %v515_v52  ;;  %v1917_v47 = vpack.c.bf16 %v642_v46, %v641_v45  ;;  %v1412_v52 = vld [vmem:[%s2826_s3 + $0x118] sm:$0xff] }
  0x7b   : > { %1846 = vmatprep.subr.bf16.mxu0 %v1845_v51 }
  0x7c   : > { %1888 = vmatpush3.bf16.msra.mxu1 %v1885_v5  ;;  %v1421_v5 = vld [vmem:[%s2826_s3 + $0x160] sm:$0xff] }
  0x7d   : > { %1890 = vmatprep.subr.bf16.mxu1 %v1889_v8  ;;  %v1945_v7 = vpack.c.bf16 %v1422_v6, %v1421_v5 }
  0x7e   : > { %1848 = vmatpush3.bf16.msra.mxu0 %v1845_v51  ;;  %v1411_v51 = vld [vmem:[%s2826_s3 + $0x110] sm:$0xff] }
  0x7f   : > { %1850 = vmatprep.subr.bf16.mxu0 %v1849_v55  ;;  %v1925_v53 = vpack.c.bf16 %v1412_v52, %v1411_v51  ;;  %v1023_v52 = vsub.s32 0, %v928_v32 }
  0x82   : > { %1852 = vmatpush3.bf16.msra.mxu0 %v1849_v55  ;;  %v1413_v55 = vld [vmem:[%s2826_s3 + $0x120] sm:$0xff] }
  0x83   : > { %1854 = vmatprep.subr.bf16.mxu0 %v1853_v58 }
  0x86   : > { %1856 = vmatpush3.bf16.msra.mxu0 %v1853_v58  ;;  %v1929_v58 = vpack.c.bf16 %v1414_v56, %v1413_v55 }
  0x87   : > { %1953 = vmatprep.subr.bf16.mxu0 %v2246_v12 }
  0x89   : > { %1632 = vmatmul.mubr.msk.f32.vlgmr.msra.gmra.mrb[0].mxu0 %vm323_vm0, %v516_v59  ;;  %v1415_v59 = vld [vmem:[%s2826_s3 + $0x130] sm:$0xff] }
  0x8a   : > { %1955 = vmatpush3.bf16.msra.mxu0 %v1954_v13  ;;  %v1933_v61 = vpack.c.bf16 %v1416_v60, %v1415_v59  ;;  %v1003_v13 = vld [vmem:[%s2828_s5 + $0x30] sm:$0xff]  ;;  %1771 = vmatprep.mubr.msk.f32.mxu0 %vm2247_vm2, %v2245_v0 }
  0x8b   : > { %1956 = vmatprep.subr.bf16.mxu0 %v2246_v12 }
  0x8e   : > { %1958 = vmatpush3.bf16.msra.mxu0 %v1957_v15  ;;  %v1963_v15 = vpack.c.bf16 %v1004_v14, %v1003_v13  ;;  %v1434_v13 = vld [vmem:[%s2828_s5 + $0x80] sm:$0xff]  ;;  %v1435_v14 = vld [vmem:[%s2828_s5 + $0x88] sm:$0xff] }
  0x8f   : > { %1959 = vmatprep.subr.bf16.mxu0 %v2246_v12 }
  0x92   : > { %1961 = vmatpush3.bf16.msra.mxu0 %v1960_v18  ;;  %v1966_v18 = vpack.c.bf16 %v1006_v17, %v1005_v16 }
  0x93   : > { %1962 = vmatprep.subr.bf16.mxu0 %v2246_v12 }
  0x96   : > { %1964 = vmatpush3.bf16.msra.mxu0 %v1963_v15 }
  0x97   : > { %1965 = vmatprep.subr.bf16.mxu0 %v2246_v12 }
  0x9a   : > { %1967 = vmatpush3.bf16.msra.mxu0 %v1966_v18 }
  0x9b   : > { %1968 = vmatprep.subr.bf16.mxu0 %v2246_v12 }
 0x15c   : > { %v1633_v20 = vpop.f32.mrb[0].mxu0 }
 0x15d   : > { %v617_v21 = vadd.f32 %v1633_v20, %v1392_v19  ;;  %v598_v22 = vpop.f32.mrb[1].mxu0  ;;  %v1008_v20 = vld [vmem:[%s2828_s5 + $0x58] sm:$0xff] }
 0x15e   : > { %v616_v23 = vadd.f32 %v1392_v19, %v598_v22  ;;  %v1007_v19 = vld [vmem:[%s2828_s5 + $0x50] sm:$0xff]  ;;  %v1009_v22 = vld [vmem:[%s2828_s5 + $0x60] sm:$0xff] }
 0x15f   : > { %v619_v26 = vmax.f32 %v617_v21, 0.0  ;;  %v1969_v21 = vpack.c.bf16 %v1008_v20, %v1007_v19 }
 0x160   : > { %v618_v27 = vmax.f32 %v616_v23, 0.0  ;;  %v1010_v23 = vld [vmem:[%s2828_s5 + $0x68] sm:$0xff] }
 0x161   : > { %624 = vst [vmem:[#allocation3 + $0x9] sm:$0xff] %v619_v26  ;;  %1970 = vmatpush3.bf16.msra.mxu0 %v1969_v21  ;;  %v1972_v24 = vpack.c.bf16 %v1010_v23, %v1009_v22  ;;  %v1978_v21 = vpack.c.bf16 %v1435_v14, %v1434_v13  ;;  %v1436_v23 = vld [vmem:[%s2828_s5 + $0x90] sm:$0xff] }
 0x162   : > { %623 = vst [vmem:[#allocation3 + $0x1] sm:$0xff] %v618_v27  ;;  %1666 = vmatprep.mubr.f32.mxu1 %v618_v27  ;;  %1971 = vmatprep.subr.bf16.mxu0 %v2246_v12 }
 0x163   : > { %1667 = vmatmul.mubr.f32.vlgmr.msra.gmra.mrb[0].mxu1 %v619_v26  ;;  %v1012_v26 = vld [vmem:[%s2828_s5 + $0x78] sm:$0xff] }
 0x164   : > { %1892 = vmatpush3.bf16.msra.mxu1 %v1889_v8  ;;  %v1423_v8 = vld [vmem:[%s2826_s3 + $0x170] sm:$0xff]  ;;  %v1975_v27 = vpack.c.bf16 %v1012_v26, %v1011_v25 }
 0x165   : > { %1894 = vmatprep.subr.bf16.mxu1 %v1893_v28  ;;  %v1949_v10 = vpack.c.bf16 %v1424_v9, %v1423_v8  ;;  %1973 = vmatpush3.bf16.msra.mxu0 %v1972_v24  ;;  %v1437_v24 = vld [vmem:[%s2828_s5 + $0x98] sm:$0xff] }
 0x166   : > { %1974 = vmatprep.subr.bf16.mxu0 %v2246_v12  ;;  %v1981_v26 = vpack.c.bf16 %v1437_v24, %v1436_v23 }
 0x168   : > { %1896 = vmatpush3.bf16.msra.mxu1 %v1893_v28  ;;  %v813_v11 = vld [vmem:[#allocation3 + $0xa] sm:$0xff]  ;;  %v2248_v28 = vmov 1983009808  }
 0x169   : > { %v625_v34 = vld [vmem:[#allocation3] sm:$0xff]  ;;  %1898 = vmatprep.subr.bf16.mxu1 %v1897_v31  ;;  %v626_v54 = vld [vmem:[#allocation3 + $0x8] sm:$0xff]  ;;  %1976 = vmatpush3.bf16.msra.mxu0 %v1975_v27  ;;  %v925_v29 = vunpack.c.l.s4 %v2248_v28  ;;  %v1439_v28 = vld [vmem:[%s2828_s5 + $0xa8] sm:$0xff] }
 0x16a   : > { %1701 = vmatprep.mubr.f32.mxu1 %v625_v34  ;;  %v812_v57 = vld [vmem:[#allocation3 + $0x2] sm:$0xff]  ;;  %1977 = vmatprep.subr.bf16.mxu0 %v2246_v12 }
 0x16b   : > { %v1438_v27 = vld [vmem:[%s2828_s5 + $0xa0] sm:$0xff] }
 0x16c   : > { %1900 = vmatpush3.bf16.msra.mxu1 %v1897_v31  ;;  %v926_v31 = vunpack.c.0.s8 %v925_v29  ;;  %v1984_v29 = vpack.c.bf16 %v1439_v28, %v1438_v27 }
 0x16d   : > { %1902 = vmatprep.subr.bf16.mxu1 %v1901_v35 }
 0x16e   : > { %v929_v36 = vsub.s32 %v926_v31, %v928_v32  ;;  %v1442_v32 = vld [vmem:[%s2828_s5 + $0xc0] sm:$0xff] }
 0x170   : > { %1904 = vmatpush3.bf16.msra.mxu1 %v1901_v35 }
 0x171   : > { %1906 = vmatprep.subr.bf16.mxu1 %v1905_v38 }
 0x174   : > { %1908 = vmatpush3.bf16.msra.mxu1 %v1905_v38 }
 0x175   : > { %1910 = vmatprep.subr.bf16.mxu1 %v1909_v41 }
 0x178   : > { %1912 = vmatpush3.bf16.msra.mxu1 %v1909_v41 }
 0x179   : > { %1914 = vmatprep.subr.bf16.mxu1 %v1913_v44 }
 0x17c   : > { %1916 = vmatpush3.bf16.msra.mxu1 %v1913_v44 }
 0x17d   : > { %1918 = vmatprep.subr.bf16.mxu1 %v1917_v47 }
 0x180   : > { %1920 = vmatpush3.bf16.msra.mxu1 %v1917_v47 }
 0x181   : > { %1922 = vmatprep.subr.bf16.mxu1 %v1921_v50 }
 0x183   : > { %1702 = vmatmul.mubr.f32.vlgmr.msra.gmra.mrb[0].mxu1 %v626_v54 }
 0x184   : > { %1924 = vmatpush3.bf16.msra.mxu1 %v1921_v50  ;;  %1736 = vmatprep.mubr.f32.mxu1 %v812_v57 }
 0x185   : > { %1926 = vmatprep.subr.bf16.mxu1 %v1925_v53 }
 0x188   : > { %1928 = vmatpush3.bf16.msra.mxu1 %v1925_v53 }
 0x189   : > { %1930 = vmatprep.subr.bf16.mxu1 %v1929_v58 }
 0x18c   : > { %1932 = vmatpush3.bf16.msra.mxu1 %v1929_v58 }
 0x18d   : > { %1934 = vmatprep.subr.bf16.mxu1 %v1933_v61 }
 0x190   : > { %1936 = vmatpush3.bf16.msra.mxu1 %v1933_v61 }
 0x191   : > { %1938 = vmatprep.subr.bf16.mxu1 %v1937_v1 }
 0x194   : > { %1940 = vmatpush3.bf16.msra.mxu1 %v1937_v1 }
 0x195   : > { %1942 = vmatprep.subr.bf16.mxu1 %v1941_v4 }
 0x198   : > { %1944 = vmatpush3.bf16.msra.mxu1 %v1941_v4 }
 0x199   : > { %1946 = vmatprep.subr.bf16.mxu1 %v1945_v7 }
 0x19c   : > { %1948 = vmatpush3.bf16.msra.mxu1 %v1945_v7 }
 0x19d   : > { %1950 = vmatprep.subr.bf16.mxu1 %v1949_v10 }
 0x1a0   : > { %1952 = vmatpush3.bf16.msra.mxu1 %v1949_v10 }
 0x1a3   : > { %1737 = vmatmul.mubr.f32.vlgmr.msra.gmra.mrb[0].mxu1 %v813_v11 }
 0x276   : > { %v1738_v34 = vpop.f32.mrb[0].mxu1 }
 0x277   : > { %v916_v35 = vadd.f32 %v1738_v34, %v1425_v33  ;;  %v897_v37 = vpop.f32.mrb[1].mxu1 }
 0x278   : > { %v915_v38 = vadd.f32 %v1425_v33, %v897_v37  ;;  %v1443_v33 = vld [vmem:[%s2828_s5 + $0xc8] sm:$0xff] }
 0x279   : > { %v918_v39 = vmax.f32 %v916_v35, 0.0  ;;  %v1990_v34 = vpack.c.bf16 %v1443_v33, %v1442_v32  ;;  %v1444_v35 = vld [vmem:[%s2828_s5 + $0xd0] sm:$0xff] }
 0x27a   : > { %v917_v40 = vmax.f32 %v915_v38, 0.0  ;;  %v1446_v38 = vld [vmem:[%s2828_s5 + $0xe0] sm:$0xff] }
 0x27b   : > { %920 = vst [vmem:[%s2679_s30 + $0x8] sm:$0xff] %v918_v39  ;;  %v940_v41 = vcombine.high %v918_v39, %v918_v39  ;;  %v947_v42 = vrot.slane %v918_v39, %v929_v36  ;;  %v1447_v39 = vld [vmem:[%s2828_s5 + $0xe8] sm:$0xff] }
 0x27c   : > { %919 = vst [vmem:[%s2679_s30] sm:$0xff] %v917_v40  ;;  %v923_v43 = vcombine.high %v917_v40, %v917_v40  ;;  %v930_v44 = vrot.slane %v917_v40, %v929_v36  ;;  %v1996_v40 = vpack.c.bf16 %v1447_v39, %v1446_v38  ;;  %s2143_s30 = scalar_lea.vmem %s2142_s14, 512 }
 0x27d   : > { %v954_v45 = vrot.slane %v940_v41, %v929_v36  ;;  %v955_v46 = vcombine.high %v947_v42, %v947_v42  ;;  %v1430_v50 = vrot.slane %v947_v42, 9  ;;  %v1448_v41 = vld [vmem:[%s2828_s5 + $0xf0] sm:$0xff]  ;;  %p2145_p13 = scmp.lt.s32.totalorder %s2143_s30, %s2137_s10 }
 0x27e   : > { %v937_v47 = vrot.slane %v923_v43, %v929_v36  ;;  %v938_v48 = vcombine.high %v930_v44, %v930_v44  ;;  %v1426_v49 = vrot.slane %v930_v44, 9  ;;  %v1445_v36 = vld [vmem:[%s2828_s5 + $0xd8] sm:$0xff] }
 0x27f   : > { %v1431_v51 = vrot.slane %v955_v46, 9  ;;  %v956_v53 = vcombine.high %v954_v45, %v954_v45  ;;  %v1432_v58 = vrot.slane %v954_v45, 9  ;;  %v993_v63 = vmax.f32 %v947_v42, %v1430_v50  ;;  %v1449_v42 = vld [vmem:[%s2828_s5 + $0xf8] sm:$0xff]  ;;  %p2146_p3 = por %p2145_p13, %p2144_p10 }
 0x280   : > { %v939_v54 = vcombine.high %v937_v47, %v937_v47  ;;  %v1427_v55 = vrot.slane %v938_v48, 9  ;;  %v1428_v56 = vrot.slane %v937_v47, 9  ;;  %v989_v57 = vmax.f32 %v930_v44, %v1426_v49 }
 0x281   : > { %v1433_v62 = vrot.slane %v956_v53, 9  ;;  %v994_v1 = vmax.f32 %v955_v46, %v1431_v51  ;;  %v995_v6 = vmax.f32 %v954_v45, %v1432_v58  ;;  %v1040_v10 = vrot.slane %v993_v63, %v1023_v52  ;;  %p2147_p7 = pnand %p2146_p3, %p2140_p8 }
 0x282   : > { %v1429_v59 = vrot.slane %v939_v54, 9  ;;  %v990_v60 = vmax.f32 %v938_v48, %v1427_v55  ;;  %v991_v61 = vmax.f32 %v937_v47, %v1428_v56  ;;  %v1024_v3 = vrot.slane %v989_v57, %v1023_v52 }
 0x283   : > { %v996_v9 = vmax.f32 %v956_v53, %v1433_v62  ;;  %v1044_v15 = vrot.slane %v994_v1, %v1023_v52  ;;  %v1048_v17 = vrot.slane %v995_v6, %v1023_v52  ;;  %v1993_v37 = vpack.c.bf16 %v1445_v36, %v1444_v35 }
 0x284   : > { %v992_v2 = vmax.f32 %v939_v54, %v1429_v59  ;;  %v1028_v4 = vrot.slane %v990_v60, %v1023_v52  ;;  %v1032_v5 = vrot.slane %v991_v61, %v1023_v52  ;;  %v1999_v43 = vpack.c.bf16 %v1449_v42, %v1448_v41 }
 0x285   : > { %v1052_v19 = vrot.slane %v996_v9, %v1023_v52 }
 0x286   : > { %v1036_v7 = vrot.slane %v992_v2, %v1023_v52  ;;  %v1054_v8 = vsel %vm1053_vm3, %v1028_v4, %v1024_v3 }
 0x287   : > { %v1056_v11 = vsel %vm1055_vm4, %v1032_v5, %v1054_v8 }
 0x288   : > { %v1058_v16 = vsel %vm1057_vm5, %v1036_v7, %v1056_v11 }
 0x289   : > { %v1060_v18 = vsel %vm1059_vm6, %v1040_v10, %v1058_v16 }
 0x28a   : > { %v1062_v20 = vsel %vm1061_vm7, %v1044_v15, %v1060_v18 }
 0x28b   : > { %v1064_v22 = vsel %vm1063_vm8, %v1048_v17, %v1062_v20 }
 0x28c   : > { %v1066_v25 = vsel %vm1065_vm9, %v1052_v19, %v1064_v22 }
 0x28d   : > { %1772 = vmatmul.mubr.f32.vlgmr.msra.gmra.mrb[2].mxu0 %v1066_v25 }
 0x28e   : > { %1979 = vmatpush3.bf16.msra.mxu0 %v1978_v21  ;;  %1806 = vmatprep.mubr.msk.f32.mxu0 %vm2247_vm2, %v2245_v0  ;;  %v1441_v0 = vld [vmem:[%s2828_s5 + $0xb8] sm:$0xff] }
 0x28f   : > { %1980 = vmatprep.subr.bf16.mxu0 %v2246_v12  ;;  %v1987_v31 = vpack.c.bf16 %v1441_v0, %v1440_v30 }
 0x292   : > { %1982 = vmatpush3.bf16.msra.mxu0 %v1981_v26 }
 0x293   : > { %1983 = vmatprep.subr.bf16.mxu0 %v2246_v12 }
 0x296   : > { %1985 = vmatpush3.bf16.msra.mxu0 %v1984_v29 }
 0x297   : > { %1986 = vmatprep.subr.bf16.mxu0 %v2246_v12 }
 0x29a   : > { %1988 = vmatpush3.bf16.msra.mxu0 %v1987_v31 }
 0x29b   : > { %1989 = vmatprep.subr.bf16.mxu0 %v2246_v12 }
 0x29e   : > { %1991 = vmatpush3.bf16.msra.mxu0 %v1990_v34 }
 0x29f   : > { %1992 = vmatprep.subr.bf16.mxu0 %v2246_v12 }
 0x2a2   : > { %1994 = vmatpush3.bf16.msra.mxu0 %v1993_v37 }
 0x2a3   : > { %1995 = vmatprep.subr.bf16.mxu0 %v2246_v12 }
 0x2a6   : > { %1997 = vmatpush3.bf16.msra.mxu0 %v1996_v40 }
 0x2a7   : > { %1998 = vmatprep.subr.bf16.mxu0 %v2246_v12 }
 0x2aa   : > { %2000 = vmatpush3.bf16.msra.mxu0 %v1999_v43 }
 0x2ad   : > { %1807 = vmatmul.mubr.f32.vlgmr.msra.gmra.mrb[4].mxu0 %v1066_v25 }
 0x2ae   : > { %2150 = shalt.err (!%p2147_p7)
}
 0x2af   : > { %s2151_s17 = scalar_lea.hbm %s2747_s11, 256  ;;  %s2155_s29 = scalar_lea.hbm %s2829_s6, 512 }
 0x2b0   : > { %p2152_p9 = scmp.ne.s32.totalorder %s2747_s11, %s2151_s17  ;;  %p2156_p5 = scmp.lt.u32.totalorder %s2747_s11, %s2829_s6 }
 0x2b1   : > { %p2157_p11 = scmp.lt.u32.totalorder %s2155_s29, %s2151_s17  ;;  %p2159_p4 = scmp.lt.u32.totalorder %s2151_s17, %s2747_s11 }
 0x2b2   : > { %p2153_p1 = pnand %p2152_p9, %p2387_p12 }
 0x2b3   : > { %p2158_p2 = por %p2157_p11, %p2156_p5 }
 0x2b4   : > { %p2154_p0 = pneg %p2153_p1 }
 0x2b5   : > { %p2160_p6 = por %p2159_p4, %p2158_p2 }
 0x2b7   : > { %p2161_p8 = pnand %p2160_p6, %p2154_p0 }
 0x2b9   : > { %2164 = shalt.err (!%p2161_p8)
}
 0x2ba   : > { %s2250_s10 = smov 128   ;;  %s2251_s16 = smov 8  }
 0x2bb   : > { %2015 = dma.vmem_to_hbm [thread:$0]  (%p2387_p12), %s2741_s23, 256, %s2747_s11, %s1228_s9, %s2250_s10, %s2250_s10, %s2251_s16  }
 0x2bc   : > { %s1385_s14 = sshll.u32 %s2438_s22, 3  ;;  %s1454_s30 = sshll.u32 %s2314_s28, 7 }
 0x2bd   : > { %s322_s17 = scalar_lea.vmem [#allocation10], %s1385_s14  ;;  %s2778_s12 = scalar_lea.hbm %s2830_s7, %s1454_s30 }
 0x2be   : > { %s1262_s20 = sshll.u32 %s322_s17, 4  ;;  %s1233_s23 = scalar_lea.sflag [#allocation11], %s2438_s22  ;;  %s2780_s20 = int_to_ptr.vmem [resolvable:$true] %s1262_s20 }
 0x2bf   : > { %s2165_s11 = scalar_lea.vmem %s2780_s20, 128  ;;  %s2252_s28 = smov [#allocation10]  }
 0x2c0   : > { %p2166_p10 = scmp.ne.s32.totalorder %s2780_s20, %s2165_s11  ;;  %s2169_s9 = sshll.u32 %s2252_s28, 4  ;;  %s2170_s9 = int_to_ptr.vmem [resolvable:$false] %s2169_s9 }
 0x2c1   : > { %s2171_s15 = scalar_lea.vmem %s2170_s9, 256  ;;  %p2172_p7 = scmp.lt.s32.totalorder %s2780_s20, %s2170_s9 }
 0x2c2   : > { %p2167_p13 = pnand %p2166_p10, %p2387_p12  ;;  %p2173_p9 = scmp.lt.s32.totalorder %s2171_s15, %s2165_s11 }
 0x2c4   : > { %p2168_p3 = pneg %p2167_p13  ;;  %p2174_p1 = por %p2173_p9, %p2172_p7 }
 0x2c6   : > { %p2175_p0 = pnand %p2174_p1, %p2168_p3 }
 0x360   : > { %v1134_v12 = vpop.f32.mrb[2].mxu0 }
 0x361   : > { %v1773_v44 = vpop.f32.mrb[3].mxu0 }
 0x380   : > { %v1221_v45 = vpop.f32.mrb[4].mxu0 }
 0x381   : > { %v1225_v46 = vmax.f32 %v1134_v12, %v1221_v45  ;;  %v1808_v47 = vpop.f32.mrb[5].mxu0 }
 0x383   : > { %1226 = vst.msk [vmem:[%s322_s17] sm:$0xff] %vm323_vm0, %v1225_v46 }
 0x384   : > { %2178 = shalt.err (!%p2175_p0)
}
 0x385   : > { %s2179_s22 = scalar_lea.hbm %s2778_s12, 128  ;;  %s2183_s14 = scalar_lea.hbm %s2830_s7, 256 }
 0x386   : > { %p2180_p5 = scmp.ne.s32.totalorder %s2778_s12, %s2179_s22  ;;  %p2184_p4 = scmp.lt.u32.totalorder %s2778_s12, %s2830_s7 }
 0x387   : > { %p2185_p6 = scmp.lt.u32.totalorder %s2183_s14, %s2179_s22  ;;  %p2187_p10 = scmp.lt.u32.totalorder %s2179_s22, %s2778_s12 }
 0x388   : > { %p2181_p11 = pnand %p2180_p5, %p2387_p12 }
 0x389   : > { %p2186_p8 = por %p2185_p6, %p2184_p4 }
 0x38a   : > { %p2182_p2 = pneg %p2181_p11 }
 0x38b   : > { %p2188_p13 = por %p2187_p10, %p2186_p8 }
 0x38d   : > { %p2189_p3 = pnand %p2188_p13, %p2182_p2 }
 0x38f   : > { %2192 = shalt.err (!%p2189_p3)
}
 0x390   : > { %2016 = dma.vmem_to_hbm [thread:$0]  (%p2387_p12), %s2780_s20, 128, %s2778_s12, %s1233_s23  }
 0x391 PF: > { %s1274_s21 = sand.u32 1, %s2227_s24   ;;  %p2847_p7 = scmp.ne.s32.totalorder %s2836_s8, 0 }
 0x392   : > { %p2848_p9 = scmp.ge.s32.totalorder %s2239_s27, 2  ;;  %s1275_s29 = scalar_lea.sflag [#allocation6], %s1274_s21 }
 0x394   : > { %p2028_p1 = pnand %p2848_p9, %p2847_p7 }
 0x396   : > { %2218 = dma.done.wait (!%p2028_p1), %s1275_s29, 256  }
 0x397   : > { %2220 = vsyncadd (!%p2028_p1), %s1275_s29, 4294967040  ;;  %s1284_s11 = scalar_lea.sflag [#allocation11], %s1274_s21 }
 0x398   : > { %2222 = dma.done.wait (!%p2028_p1), %s1284_s11, 128  }
 0x399   : > { %2224 = vsyncadd (!%p2028_p1), %s1284_s11, 4294967168  ;;  %p25_p12 = scmp.ge.s32.totalorder %s2349_s13, 4   ;;  %s2849_s24 = smov %s2231_s25 }
 0x39a   : > { %s2850_s25 = smov %s2235_s26  ;;  %s2851_s26 = smov %s2383_s18 }
 0x39b   : > { %s2852_s27 = smov %s2349_s13  ;;  %27 = sbr.rel (!%p25_p12) target bundleno = 8 (0x8), region = 115 }
 0x3a2   :  { %1289 = vsyncpa [#allocation5], 1 }
 0x3a3   :  { %1291 = vsyncpa [#allocation5 + $0x1], 1 }
 0x3a4   :  { %1292 = vsyncpa [#allocation8], 1 }
 0x3a5   :  { %1293 = vsyncpa [#allocation6], 1 }
 0x3a6   :  { %1295 = vsyncpa [#allocation6 + $0x1], 1 }
 0x3a7   :  { %1296 = vsyncpa [#allocation11], 1 }
 0x3a8   :  { %1298 = vsyncpa [#allocation11 + $0x1], 1 }

</bundles_post_ra>
